<compile_context>
chip_gen: v7x
topology: tpu7x:2x2x1
jax: 0.10.0
libtpu: 0.0.40
codegen_flags: <defaults>
</compile_context>

<pallas_src>
import functools
import math

import jax
import jax.numpy as jnp
import numpy as np
from jax.experimental import pallas as pl
from jax.experimental.pallas import tpu as pltpu


# ------------------------------- Pallas kernels -----------------------------
def _resid_linear_id_kernel(x_ref, w1_ref, b1_ref, w2_ref, b2_ref, o_ref):
    # in_channels == out_channels: project == Identity
    #   out = x + tanh(x @ W1 + b1) @ W2 + b2
    x = x_ref[...]
    h = jnp.tanh(jnp.dot(x, w1_ref[...], preferred_element_type=jnp.float32)
                 + b1_ref[...])
    o_ref[...] = (x
                  + jnp.dot(h, w2_ref[...], preferred_element_type=jnp.float32)
                  + b2_ref[...])


def _resid_linear_proj_kernel(x_ref, wcat_ref, bcat_ref, w2_ref, b2_ref, o_ref,
                              *, cout):
    # in_channels != out_channels: project is its own Linear.
    # Wcat = [W1 | Wp], bcat = [b1 | bp] (pre-fused at init) -> ONE MXU pass
    # over x produces both the hidden pre-activation and the projection.
    x = x_ref[...]
    t = jnp.dot(x, wcat_ref[...], preferred_element_type=jnp.float32) + bcat_ref[...]
    h = jnp.tanh(t[:, :cout])          # hidden branch
    proj = t[:, cout:]                 # residual/projection branch
    o_ref[...] = (proj
                  + jnp.dot(h, w2_ref[...], preferred_element_type=jnp.float32)
                  + b2_ref[...])


# ------------------------------- tile selection ------------------------------
def _round_up(v, m):
    return ((v + m - 1) // m) * m


def _choose_row_tile(n, cin, cout):
    """Largest 8-aligned row tile that fits a conservative VMEM budget."""
    # Double-buffered activation tiles: x tile (tm, cin) + out tile (tm, cout),
    # f32. 16 MiB budget leaves plenty of headroom for weights + compiler
    # scratch inside v7x's 32 MiB scoped-VMEM default (and trivially fits
    # v5e/v6e's 128 MiB).
    budget = 16 * 1024 * 1024
    per_row = 2 * 4 * (cin + 2 * cout)      # 2 buffers * f32 * (x row + out row + slack)
    tm = max(8, min(1024, (budget // per_row) // 8 * 8))

    n8 = _round_up(n, 8)
    tm = min(tm, n8)

    # Give the parallel row axis >= 2 grid steps when there is enough work so
    # v7x's two TensorCores both get a shard (harmless on v5e/v6e).
    if n8 > 8 and pl.cdiv(n, tm) < 2:
        tm = max(8, _round_up(pl.cdiv(n, 2), 8))
    return tm


# --------------------------------- wrapper ----------------------------------
def residual_linear(params, x):
    """Fused ResidualLinear forward. x: (N, in_channels) float32."""
    n, cin = x.shape
    cout = params["W2"].shape[1]
    identity = "Wcat" not in params

    if identity:
        kernel = _resid_linear_id_kernel
        weights = (params["W1"], params["b1"], params["W2"], params["b2"])
    else:
        kernel = functools.partial(_resid_linear_proj_kernel, cout=cout)
        weights = (params["Wcat"], params["bcat"], params["W2"], params["b2"])

    tm = _choose_row_tile(n, cin, cout)
    grid = (pl.cdiv(n, tm),)                 # ragged last block is masked by Pallas

    row_map = lambda i: (i, 0)
    whole_map = lambda i: (0, 0)             # weights: resident, DMA'd once

    in_specs = [pl.BlockSpec((tm, cin), row_map)]
    in_specs += [pl.BlockSpec(w.shape, whole_map) for w in weights]

    return pl.pallas_call(
        kernel,
        out_shape=jax.ShapeDtypeStruct((n, cout), jnp.float32),
        grid=grid,
        in_specs=in_specs,
        out_specs=pl.BlockSpec((tm, cout), row_map),
        compiler_params=pltpu.CompilerParams(
            dimension_semantics=("parallel",)),
    )(x, *weights)


# ---------------------------- params / reference ----------------------------
def init_residual_linear(key, in_channels, out_channels):
    """Weights stored (in, out); biases (1, out); projection pre-fused as Wcat/bcat."""
    ks = jax.random.split(key, 6)

    def lin(kw, kb, din, dout):
        bound = 1.0 / math.sqrt(din)
        w = jax.random.uniform(kw, (din, dout), jnp.float32, -bound, bound)
        b = jax.random.uniform(kb, (1, dout), jnp.float32, -bound, bound)
        return w, b

    p = {}
    p["W1"], p["b1"] = lin(ks[0], ks[1], in_channels, out_channels)
    p["W2"], p["b2"] = lin(ks[2], ks[3], out_channels, out_channels)
    if in_channels != out_channels:
        p["Wp"], p["bp"] = lin(ks[4], ks[5], in_channels, out_channels)
        # Pre-fuse once so the kernel needs a single x-side matmul.
        p["Wcat"] = jnp.concatenate([p["W1"], p["Wp"]], axis=1)
        p["bcat"] = jnp.concatenate([p["b1"], p["bp"]], axis=1)
    return p


def residual_linear_ref(params, x):
    h = jnp.tanh(x @ params["W1"] + params["b1"])
    y = h @ params["W2"] + params["b2"]
    proj = (x @ params["Wp"] + params["bp"]) if "Wp" in params else x
    return proj + y


# ----------------------------------- main -----------------------------------
if __name__ == "__main__":
    key = jax.random.PRNGKey(0)
    kx1, kx2, kx3, kx4, kp1, kp2, kp3, kp4 = jax.random.split(key, 8)

    # Case 1: in != out -> projection Linear fused in (tiny, launch-bound).
    x1 = jax.random.normal(kx1, (8, 16), jnp.float32)
    p1 = init_residual_linear(kp1, 16, 32)
    out1 = residual_linear(p1, x1)

    # Case 2: in == out -> project is Identity.
    x2 = jax.random.normal(kx2, (8, 32), jnp.float32)
    p2 = init_residual_linear(kp2, 32, 32)
    out2 = residual_linear(p2, x2)

    # Case 3: lane-dense, row-tiled path; tile shrunk so the parallel row axis
    # has 2 steps (v7x megacore sharding).
    x3 = jax.random.normal(kx3, (256, 128), jnp.float32)
    p3 = init_residual_linear(kp3, 128, 128)
    out3 = residual_linear(p3, x3)

    # Case 4: non-divisible N exercises the cdiv grid + masked ragged block.
    x4 = jax.random.normal(kx4, (300, 64), jnp.float32)
    p4 = init_residual_linear(kp4, 64, 96)
    out4 = residual_linear(p4, x4)

    jax.block_until_ready((out1, out2, out3, out4))
    assert out1.shape == (8, 32)
    assert out2.shape == (8, 32)
    assert out3.shape == (256, 128)
    assert out4.shape == (300, 96)

    for out, p, x in ((out1, p1, x1), (out2, p2, x2),
                      (out3, p3, x3), (out4, p4, x4)):
        np.testing.assert_allclose(np.asarray(out),
                                   np.asarray(residual_linear_ref(p, x)),
                                   rtol=1e-4, atol=1e-4)
    print("KERNEL_OK")
</pallas_src>

<mosaic_0001>
module attributes {stable_mosaic.version = 11 : i64} {
  func.func @_resid_linear_proj_kernel(%arg0: i32, %arg1: memref<8x16xf32, #tpu.memory_space<vmem>>, %arg2: memref<16x64xf32, #tpu.memory_space<vmem>>, %arg3: memref<1x64xf32, #tpu.memory_space<vmem>>, %arg4: memref<32x32xf32, #tpu.memory_space<vmem>>, %arg5: memref<1x32xf32, #tpu.memory_space<vmem>>, %arg6: memref<8x32xf32, #tpu.memory_space<vmem>>) attributes {dimension_semantics = [#tpu.dimension_semantics<parallel>], iteration_bounds = array<i64: 1>, scalar_prefetch = 0 : i64, scratch_operands = 0 : i64, tpu.core_type = #tpu.core_type<tc>, window_params = [{transform_indices = @transform_0, window_bounds = array<i64: 8, 16>}, {pipeline_mode = #tpu.pipeline_mode<synchronous>, transform_indices = @transform_1, window_bounds = array<i64: 16, 64>}, {pipeline_mode = #tpu.pipeline_mode<synchronous>, transform_indices = @transform_2, window_bounds = array<i64: 1, 64>}, {pipeline_mode = #tpu.pipeline_mode<synchronous>, transform_indices = @transform_3, window_bounds = array<i64: 32, 32>}, {pipeline_mode = #tpu.pipeline_mode<synchronous>, transform_indices = @transform_4, window_bounds = array<i64: 1, 32>}, {transform_indices = @transform_5, window_bounds = array<i64: 8, 32>}]} {
    %c0 = arith.constant 0 : index
    %c0_0 = arith.constant 0 : index
    %0 = vector.load %arg1[%c0, %c0_0] : memref<8x16xf32, #tpu.memory_space<vmem>>, vector<8x16xf32>
    %c0_1 = arith.constant 0 : index
    %c0_2 = arith.constant 0 : index
    %1 = vector.load %arg2[%c0_1, %c0_2] : memref<16x64xf32, #tpu.memory_space<vmem>>, vector<16x64xf32>
    %cst = arith.constant dense<0.000000e+00> : vector<8x64xf32>
    %2 = tpu.matmul %0, %1, %cst {dimension_numbers = #tpu.dot_dimension_numbers<[1], [0], [0], [1], [0, 0, 1, 1], [], []>} : vector<8x16xf32>, vector<16x64xf32>, vector<8x64xf32> -> vector<8x64xf32>
    %c0_3 = arith.constant 0 : index
    %c0_4 = arith.constant 0 : index
    %3 = vector.load %arg3[%c0_3, %c0_4] : memref<1x64xf32, #tpu.memory_space<vmem>>, vector<1x64xf32>
    %4 = vector.broadcast %3 : vector<1x64xf32> to vector<8x64xf32>
    %5 = arith.addf %2, %4 : vector<8x64xf32>
    %6 = vector.extract_strided_slice %5 {offsets = [0, 0], sizes = [8, 32], strides = [1, 1]} : vector<8x64xf32> to vector<8x32xf32>
    %7 = math.tanh %6 : vector<8x32xf32>
    %8 = vector.extract_strided_slice %5 {offsets = [0, 32], sizes = [8, 32], strides = [1, 1]} : vector<8x64xf32> to vector<8x32xf32>
    %c0_5 = arith.constant 0 : index
    %c0_6 = arith.constant 0 : index
    %9 = vector.load %arg4[%c0_5, %c0_6] : memref<32x32xf32, #tpu.memory_space<vmem>>, vector<32x32xf32>
    %cst_7 = arith.constant dense<0.000000e+00> : vector<8x32xf32>
    %10 = tpu.matmul %7, %9, %cst_7 {dimension_numbers = #tpu.dot_dimension_numbers<[1], [0], [0], [1], [0, 0, 1, 1], [], []>} : vector<8x32xf32>, vector<32x32xf32>, vector<8x32xf32> -> vector<8x32xf32>
    %11 = arith.addf %8, %10 : vector<8x32xf32>
    %c0_8 = arith.constant 0 : index
    %c0_9 = arith.constant 0 : index
    %12 = vector.load %arg5[%c0_8, %c0_9] : memref<1x32xf32, #tpu.memory_space<vmem>>, vector<1x32xf32>
    %13 = vector.broadcast %12 : vector<1x32xf32> to vector<8x32xf32>
    %14 = arith.addf %11, %13 : vector<8x32xf32>
    %c0_10 = arith.constant 0 : index
    %c0_11 = arith.constant 0 : index
    %15 = vector.load %arg6[%c0_10, %c0_11] : memref<8x32xf32, #tpu.memory_space<vmem>>, vector<8x32xf32>
    tpu.vector_store %arg6[%c0_10, %c0_11], %14 {strides = array<i32>} : memref<8x32xf32, #tpu.memory_space<vmem>>, vector<8x32xf32>,
    return
  }
  func.func @transform_0(%arg0: i32) -> (i32, i32) {
    %c0_i32 = arith.constant 0 : i32
    %c0_i32_0 = arith.constant 0 : i32
    return %arg0, %c0_i32 : i32, i32
  }
  func.func @transform_1(%arg0: i32) -> (i32, i32) {
    %c0_i32 = arith.constant 0 : i32
    %c0_i32_0 = arith.constant 0 : i32
    %c0_i32_1 = arith.constant 0 : i32
    return %c0_i32, %c0_i32_0 : i32, i32
  }
  func.func @transform_2(%arg0: i32) -> (i32, i32) {
    %c0_i32 = arith.constant 0 : i32
    %c0_i32_0 = arith.constant 0 : i32
    %c0_i32_1 = arith.constant 0 : i32
    return %c0_i32, %c0_i32_0 : i32, i32
  }
  func.func @transform_3(%arg0: i32) -> (i32, i32) {
    %c0_i32 = arith.constant 0 : i32
    %c0_i32_0 = arith.constant 0 : i32
    %c0_i32_1 = arith.constant 0 : i32
    return %c0_i32, %c0_i32_0 : i32, i32
  }
  func.func @transform_4(%arg0: i32) -> (i32, i32) {
    %c0_i32 = arith.constant 0 : i32
    %c0_i32_0 = arith.constant 0 : i32
    %c0_i32_1 = arith.constant 0 : i32
    return %c0_i32, %c0_i32_0 : i32, i32
  }
  func.func @transform_5(%arg0: i32) -> (i32, i32) {
    %c0_i32 = arith.constant 0 : i32
    %c0_i32_0 = arith.constant 0 : i32
    return %arg0, %c0_i32 : i32, i32
  }
}

</mosaic_0001>

<bundles_post_ra>
// kernel: tpu_custom_call.1
= control target key start
LH: loop header
LB: loop body
LE: loop exit
PB: predicated region body
PF: predicated region fallthrough
CT: control target
= control target key end

     0   :  { %10 = vsyncpa [#allocation3], 0  ;;  %s508_s0 = inlined_call_operand.hbm [shape: f32[8,16], index: 0, kind: input, shape index: {}]   ;;  %s509_s1 = inlined_call_operand.hbm [shape: f32[16,64], index: 1, kind: input, shape index: {}]   ;;  %s510_s2 = inlined_call_operand.vmem [shape: f32[1,64], index: 2, kind: input, shape index: {}]   ;;  %s511_s3 = inlined_call_operand.hbm [shape: f32[32,32], index: 3, kind: input, shape index: {}]   ;;  %s512_s4 = inlined_call_operand.vmem [shape: f32[1,32], index: 4, kind: input, shape index: {}]   ;;  %s513_s5 = inlined_call_operand.hbm [shape: f32[8,32], index: 5, kind: output, shape index: {}]  }
   0x1   :  { %11 = vsyncpa [#allocation6], 0 }
   0x2   :  { %12 = vsyncpa [#allocation4], 0  ;;  %s405_s18 = smov [#allocation5]   ;;  %s311_s22 = scalar_lea.hbm %s509_s1, 256 }
   0x3   :  { %s28_s19 = sshll.u32 %s405_s18, 4  ;;  %p312_p0 = scmp.ne.s32.totalorder %s509_s1, %s311_s22  ;;  %s29_s19 = int_to_ptr.vmem [resolvable:$true] %s28_s19 }
   0x4   :  { %p315_p1 = scmp.lt.u32.totalorder %s311_s22, %s509_s1 }
   0x6   :  { %p317_p2 = pnand %p315_p1, %p312_p0 }
   0x8   :  { %320 = shalt.err (!%p317_p2)
}
   0x9   :  { %s321_s27 = scalar_lea.vmem %s29_s19, 256  ;;  %p326_p4 = scmp.lt.s32.totalorder %s29_s19, %s29_s19 }
   0xa   :  { %p322_p3 = scmp.ne.s32.totalorder %s29_s19, %s321_s27  ;;  %p327_p5 = scmp.lt.s32.totalorder %s321_s27, %s321_s27 }
   0xc   :  { %p328_p6 = por %p327_p5, %p326_p4 }
   0xe   :  { %p329_p7 = pnand %p328_p6, %p322_p3 }
  0x10   :  { %332 = shalt.err (!%p329_p7)
}
  0x11   :  { %s406_s28 = smov 128   ;;  %s407_s29 = smov 8  }
  0x12   :  { %34 = dma.hbm_to_vmem [thread:$0]  %s509_s1, 256, %s29_s19, [#allocation6], %s406_s28, %s406_s28, %s407_s29  }
  0x13   :  { %s408_s7 = smov [#allocation2]   ;;  %s409_s9 = smov [#allocation7]  }
  0x14   :  { %s19_s8 = sshll.u32 %s408_s7, 4  ;;  %s42_s10 = sshll.u32 %s409_s9, 4  ;;  %s20_s8 = int_to_ptr.vmem [resolvable:$true] %s19_s8  ;;  %s43_s10 = int_to_ptr.vmem [resolvable:$true] %s42_s10 }
  0x15   :  { %s333_s13 = scalar_lea.hbm %s508_s0, 128 }
  0x16   :  { %p334_p8 = scmp.ne.s32.totalorder %s508_s0, %s333_s13  ;;  %p337_p9 = scmp.lt.u32.totalorder %s333_s13, %s508_s0 }
  0x18   :  { %p339_p10 = pnand %p337_p9, %p334_p8 }
  0x1a   :  { %342 = shalt.err (!%p339_p10)
}
  0x1b   :  { %s343_s1 = scalar_lea.vmem %s20_s8, 128  ;;  %p348_p12 = scmp.lt.s32.totalorder %s20_s8, %s20_s8 }
  0x1c   :  { %p344_p11 = scmp.ne.s32.totalorder %s20_s8, %s343_s1  ;;  %p349_p13 = scmp.lt.s32.totalorder %s343_s1, %s343_s1 }
  0x1e   :  { %p350_p0 = por %p349_p13, %p348_p12 }
  0x20   :  { %p351_p1 = pnand %p350_p0, %p344_p11 }
  0x22   :  { %354 = shalt.err (!%p351_p1)
}
  0x23   :  { %22 = dma.hbm_to_vmem [thread:$0]  %s508_s0, 128, %s20_s8, [#allocation3]  }
  0x24   :  { %s355_s22 = scalar_lea.hbm %s511_s3, 512 }
  0x25   :  { %p356_p2 = scmp.ne.s32.totalorder %s511_s3, %s355_s22  ;;  %p359_p3 = scmp.lt.u32.totalorder %s355_s22, %s511_s3 }
  0x27   :  { %p361_p4 = pnand %p359_p3, %p356_p2 }
  0x29   :  { %364 = shalt.err (!%p361_p4)
}
  0x2a   :  { %s365_s27 = scalar_lea.vmem %s43_s10, 512  ;;  %p370_p6 = scmp.lt.s32.totalorder %s43_s10, %s43_s10 }
  0x2b   :  { %p366_p5 = scmp.ne.s32.totalorder %s43_s10, %s365_s27  ;;  %p371_p7 = scmp.lt.s32.totalorder %s365_s27, %s365_s27 }
  0x2d   :  { %p372_p8 = por %p371_p7, %p370_p6 }
  0x2f   :  { %p373_p9 = pnand %p372_p8, %p366_p5 }
  0x31   :  { %376 = shalt.err (!%p373_p9)
}
  0x32   :  { %48 = dma.hbm_to_vmem [thread:$0]  %s511_s3, 512, %s43_s10, [#allocation6], %s406_s28, %s406_s28, %s407_s29  }
  0x33   :  { %399 = dma.done.wait [#allocation3], 128  }
  0x34   :  { %400 = vsyncadd [#allocation3], 4294967168 }
  0x35   :  { %401 = dma.done.wait [#allocation6], 768  }
  0x36   :  { %402 = vsyncadd [#allocation6], 4294966528  ;;  %v410_v0 = vmov 0.0|0.0   ;;  %vm411_vm0 = vmmov 0   ;;  %v412_v1 = vmov 0.0   ;;  %v61_v2 = vld [vmem:[#allocation5] sm:$0xff] }
  0x37   :  { %289 = vmatprep.subr.bf16.mxu0 %v410_v0  ;;  %275 = vmatprep.mubr.msk.f32.mxu0 %vm411_vm0, %v412_v1  ;;  %v62_v3 = vld [vmem:[#allocation5 + $0x8] sm:$0xff]  ;;  %v60_v5 = vld [vmem:[#allocation2] sm:$0xff]  ;;  %vm70_vm1 = vcmask 130048   ;;  %v145_v6 = vld [vmem:[#allocation7] sm:$0xff]  ;;  %vm149_vm2 = vcmask 261120   ;;  %s413_s29 = smov 32  }
  0x38   :  { %292 = vmatprep.subr.bf16.mxu1 %v410_v0  ;;  %286 = vmatprep.mubr.msk.f32.mxu1 %vm411_vm0, %v412_v1  ;;  %v290_v4 = vpack.c.bf16 %v62_v3, %v61_v2  ;;  %v146_v7 = vld [vmem:[#allocation7 + $0x8] sm:$0xff]  ;;  %v147_v8 = vld [vmem:[#allocation7 + $0x10] sm:$0xff]  ;;  %v148_v10 = vld [vmem:[#allocation7 + $0x18] sm:$0xff]  ;;  %s415_s8 = smov [#allocation8]  }
  0x39   :  { %v293_v9 = vpack.c.bf16 %v146_v7, %v145_v6  ;;  %v296_v11 = vpack.c.bf16 %v148_v10, %v147_v8  ;;  %v259_v12 = vld [vmem:[%s510_s2] ss:$0 sm:$0xff]  ;;  %s414_s2 = smov 96   ;;  %s249_s9 = sshll.u32 %s415_s8, 4  ;;  %s250_s9 = int_to_ptr.vmem [resolvable:$true] %s249_s9 }
  0x3a   :  { %291 = vmatpush3.bf16.msra.mxu0 %v290_v4  ;;  %v262_v19 = vld [vmem:[%s512_s4] ss:$0 sm:$0xff]  ;;  %s377_s10 = scalar_lea.vmem %s250_s9, 128  ;;  %p382_p11 = scmp.lt.s32.totalorder %s250_s9, %s250_s9 }
  0x3b   :  { %294 = vmatpush3.bf16.msra.mxu1 %v293_v9  ;;  %p378_p10 = scmp.ne.s32.totalorder %s250_s9, %s377_s10  ;;  %p383_p12 = scmp.lt.s32.totalorder %s377_s10, %s377_s10 }
  0x3c   :  { %295 = vmatprep.subr.bf16.mxu1 %v410_v0 }
  0x3d   :  { %276 = vmatmul.mubr.msk.f32.vlgmr.msra.gmra.mrb[0].mxu0 %vm70_vm1, %v60_v5  ;;  %p384_p13 = por %p383_p12, %p382_p11 }
  0x3f   :  { %297 = vmatpush3.bf16.msra.mxu1 %v296_v11  ;;  %p385_p0 = pnand %p384_p13, %p378_p10 }
 0x110   :  { %v140_v13 = vpop.f32.mrb[0].mxu0 }
 0x111   :  { %v141_v14 = vadd.f32 %v259_v12, %v140_v13  ;;  %v277_v15 = vpop.f32.mrb[1].mxu0 }
 0x113   :  { %309 = vtanh.f32 %v141_v14 }
 0x11d   :  { %v310_v16 = vpop.eup %309 }
 0x11e   :  { %287 = vmatmul.mubr.msk.f32.vlgmr.msra.gmra.mrb[0].mxu1 %vm149_vm2, %v310_v16 }
 0x1f1   :  { %v219_v17 = vpop.f32.mrb[0].mxu1 }
 0x1f2   :  { %224 = vrot.lane.b32.xlu0 %v219_v17, %s413_s29  ;;  %v288_v18 = vpop.f32.mrb[1].mxu1 }
 0x1f6   :  { %234 = vrot.lane.b32.xlu0 %v262_v19, %s413_s29 }
 0x264   :  { %v225_v20 = vpop.permute.xlu0 %224 }
 0x265   :  { %v227_v21 = vadd.f32 %v225_v20, %v141_v14 }
 0x268   :  { %v235_v22 = vpop.permute.xlu0 %234 }
 0x269   :  { %v237_v23 = vadd.f32 %v235_v22, %v227_v21 }
 0x26b   :  { %239 = vrot.lane.b32.xlu1 %v237_v23, %s414_s2 }
 0x2dd   :  { %v240_v24 = vpop.permute.xlu1 %239 }
 0x2de   :  { %242 = vst.msk [vmem:[#allocation8] sm:$0xff] %vm149_vm2, %v240_v24 }
 0x2df   :  { %388 = shalt.err (!%p385_p0)
}
 0x2e0   :  { %s389_s12 = scalar_lea.hbm %s513_s5, 128 }
 0x2e1   :  { %p390_p1 = scmp.ne.s32.totalorder %s513_s5, %s389_s12  ;;  %p393_p2 = scmp.lt.u32.totalorder %s389_s12, %s513_s5 }
 0x2e3   :  { %p395_p3 = pnand %p393_p2, %p390_p1 }
 0x2e5   :  { %398 = shalt.err (!%p395_p3)
}
 0x2e6   :  { %252 = dma.vmem_to_hbm [thread:$0]  %s250_s9, 128, %s513_s5, [#allocation4]  }
 0x2e7   :  { %403 = dma.done.wait [#allocation4], 128  }
 0x2e8   :  { %404 = vsyncadd [#allocation4], 4294967168 }
 0x2e9   :  { %256 = vsyncpa [#allocation3], 1 }
 0x2ea   :  { %257 = vsyncpa [#allocation6], 1 }
 0x2eb   :  { %258 = vsyncpa [#allocation4], 1 }

</bundles_post_ra>
